<compile_context>
chip_gen: v5e
topology: v5e:2x2
jax: 0.10.0
libtpu: 0.0.40
codegen_flags: <defaults>
</compile_context>

<pallas_src>
import jax
import jax.numpy as jnp
from jax.experimental import pallas as pl
from jax.experimental.pallas import tpu as pltpu


def _round_up(x, m):
    return (x + m - 1) // m * m


def _cdiv(a, b):
    return -(-a // b)


def _block_diag(w, g):
    """(k, n) -> (g*k, g*n) block-diagonal with g copies of w on the diagonal."""
    if g == 1:
        return w
    k, n = w.shape
    eye = jnp.eye(g, dtype=w.dtype)
    return (eye[:, None, :, None] * w[None, :, None, :]).reshape(g * k, g * n)


def _seq2emb_kernel(x_ref, w1_ref, b1_ref, w2_ref, b2_ref, o_ref):
    # x_ref:  (TMq, Kp)  bf16  -- Kp = group*4 packed input features
    # w1_ref: (Kp, Hp)   bf16  -- block-diag of `group` copies of fc_1 weight
    # b1_ref: (1,  Hp)   f32
    # w2_ref: (Hp, Np)   bf16  -- block-diag of `group` copies of fc_2 weight
    # b2_ref: (1,  Np)   f32
    # o_ref:  (TMq, Np)  f32   -- Np = group*out_dim (lane-dense: 128 when out_dim=32)
    h = jnp.dot(x_ref[...], w1_ref[...],
                preferred_element_type=jnp.float32,
                precision=jax.lax.Precision.DEFAULT) + b1_ref[...]
    h = jnp.maximum(h, 0.0)  # ReLU; dropout(p=0.1) is identity at inference time
    y = jnp.dot(h.astype(jnp.bfloat16), w2_ref[...],
                preferred_element_type=jnp.float32,
                precision=jax.lax.Precision.DEFAULT) + b2_ref[...]
    o_ref[...] = y.astype(o_ref.dtype)


def seq2emb(seq, w1, b1, w2, b2, *, tm=4096):
    """seq: (B, T, 4) float32 -> (B, T, output_dim) float32."""
    B, T, F = seq.shape
    assert F == 4
    hidden = w1.shape[1]
    out_dim = w2.shape[1]
    M = B * T

    # Pack `group` consecutive rows into one kernel row: output block becomes 128 lanes
    # wide (unmasked stores) and the input block >= 16 lanes.  Both views are free.
    group = 128 // out_dim if (out_dim < 128 and 128 % out_dim == 0) else 1
    row_align = 8 * group            # tm multiple of this => (tm // group) multiple of 8
    kp = group * F                   # packed input width
    hp = group * hidden              # packed hidden width
    np_ = group * out_dim            # packed output width

    # Grid sizing: minimize tail padding; keep >= 2 blocks for moderately large M so a
    # v7x megacore puts work on both TensorCores (no effect on 1-TC v5e/v6e).
    min_blocks = 2 if M >= 2048 else 1
    n_blocks = max(min_blocks, _cdiv(M, tm))
    tm = _round_up(_cdiv(M, n_blocks), row_align)
    m_pad = n_blocks * tm
    tmq = tm // group

    x2d = seq.reshape(M, F).astype(jnp.float32)
    if m_pad != M:
        x2d = jnp.pad(x2d, ((0, m_pad - M), (0, 0)))
    # Free row-major view: packed row r holds original rows r*group .. r*group+group-1.
    x_packed = x2d.reshape(m_pad // group, kp).astype(jnp.bfloat16)

    # Block-diagonal packed weights (tiny, built once); bf16 for single-pass MXU.
    w1_bd = _block_diag(w1.astype(jnp.float32), group).astype(jnp.bfloat16)
    w2_bd = _block_diag(w2.astype(jnp.float32), group).astype(jnp.bfloat16)
    b1_bd = jnp.tile(b1.astype(jnp.float32), group).reshape(1, hp)
    b2_bd = jnp.tile(b2.astype(jnp.float32), group).reshape(1, np_)

    flops = 2 * M * (F * hidden + hidden * out_dim)
    bytes_accessed = (2 * m_pad * F                       # x (bf16)
                      + 2 * (kp * hp + hp * np_)          # packed weights (bf16)
                      + 4 * (hp + np_)                    # biases (f32)
                      + 4 * m_pad * out_dim)              # output (f32)

    out_packed = pl.pallas_call(
        _seq2emb_kernel,
        out_shape=jax.ShapeDtypeStruct((m_pad // group, np_), jnp.float32),
        grid=(n_blocks,),
        in_specs=[
            pl.BlockSpec((tmq, kp), lambda i: (i, 0)),    # x tile (double-buffered)
            pl.BlockSpec((kp, hp), lambda i: (0, 0)),     # W1 block-diag: VMEM resident
            pl.BlockSpec((1, hp), lambda i: (0, 0)),      # b1
            pl.BlockSpec((hp, np_), lambda i: (0, 0)),    # W2 block-diag: VMEM resident
            pl.BlockSpec((1, np_), lambda i: (0, 0)),     # b2
        ],
        out_specs=pl.BlockSpec((tmq, np_), lambda i: (i, 0)),
        compiler_params=pltpu.CompilerParams(
            dimension_semantics=("parallel",),
            vmem_limit_bytes=32 * 1024 * 1024,
        ),
        cost_estimate=pl.CostEstimate(
            flops=flops, transcendentals=0, bytes_accessed=bytes_accessed),
    )(x_packed, w1_bd, b1_bd, w2_bd, b2_bd)

    # (m_pad//group, group*out_dim) row-major is exactly (m_pad, out_dim): free view.
    out2d = out_packed.reshape(m_pad, out_dim)[:M]
    return out2d.reshape(B, T, out_dim)


def reference(seq, w1, b1, w2, b2):
    h = jnp.maximum(seq @ w1 + b1, 0.0)
    return h @ w2 + b2


if __name__ == "__main__":
    key = jax.random.PRNGKey(0)
    k_seq, k_w1, k_b1, k_w2, k_b2 = jax.random.split(key, 5)

    B, T, F = 2, 8, 4          # seq input: (batch, seq_len, 4)
    hidden = 256               # fc_1: Linear(4, 256)
    output_dim = 32            # fc_2: Linear(256, output_dim)

    seq = jax.random.normal(k_seq, (B, T, F), dtype=jnp.float32)
    # Deterministic synthetic params (uniform, like torch.nn.Linear default range).
    w1 = jax.random.uniform(k_w1, (F, hidden), jnp.float32, -0.5, 0.5)
    b1 = jax.random.uniform(k_b1, (hidden,), jnp.float32, -0.5, 0.5)
    w2 = jax.random.uniform(k_w2, (hidden, output_dim), jnp.float32, -0.0625, 0.0625)
    b2 = jax.random.uniform(k_b2, (output_dim,), jnp.float32, -0.0625, 0.0625)

    out = seq2emb(seq, w1, b1, w2, b2)
    jax.block_until_ready(out)
    ref = reference(seq, w1, b1, w2, b2)
    assert out.shape == (B, T, output_dim)
    # bf16 MXU operands with f32 accumulation -> loosen tolerance vs. f32 reference.
    assert jnp.allclose(out, ref, atol=2e-2, rtol=2e-2), "mismatch vs reference"

    # Ragged-tail check: M = 15 is not a multiple of the pack group (4) -> padding path.
    seq2 = jax.random.normal(jax.random.PRNGKey(1), (3, 5, F), dtype=jnp.float32)
    out2 = seq2emb(seq2, w1, b1, w2, b2)
    jax.block_until_ready(out2)
    ref2 = reference(seq2, w1, b1, w2, b2)
    assert out2.shape == (3, 5, output_dim)
    assert jnp.allclose(out2, ref2, atol=2e-2, rtol=2e-2), "mismatch vs reference (ragged)"

    print("KERNEL_OK")
</pallas_src>

<mosaic_0001>
module attributes {stable_mosaic.version = 11 : i64} {
  func.func @_seq2emb_kernel(%arg0: i32, %arg1: memref<8x16xbf16, #tpu.memory_space<vmem>>, %arg2: memref<16x1024xbf16, #tpu.memory_space<vmem>>, %arg3: memref<1x1024xf32, #tpu.memory_space<vmem>>, %arg4: memref<1024x128xbf16, #tpu.memory_space<vmem>>, %arg5: memref<1x128xf32, #tpu.memory_space<vmem>>, %arg6: memref<8x128xf32, #tpu.memory_space<vmem>>) attributes {dimension_semantics = [#tpu.dimension_semantics<parallel>], iteration_bounds = array<i64: 1>, scalar_prefetch = 0 : i64, scratch_operands = 0 : i64, tpu.core_type = #tpu.core_type<tc>, window_params = [{transform_indices = @transform_0, window_bounds = array<i64: 8, 16>}, {pipeline_mode = #tpu.pipeline_mode<synchronous>, transform_indices = @transform_1, window_bounds = array<i64: 16, 1024>}, {pipeline_mode = #tpu.pipeline_mode<synchronous>, transform_indices = @transform_2, window_bounds = array<i64: 1, 1024>}, {pipeline_mode = #tpu.pipeline_mode<synchronous>, transform_indices = @transform_3, window_bounds = array<i64: 1024, 128>}, {pipeline_mode = #tpu.pipeline_mode<synchronous>, transform_indices = @transform_4, window_bounds = array<i64: 1, 128>}, {transform_indices = @transform_5, window_bounds = array<i64: 8, 128>}]} {
    %c0 = arith.constant 0 : index
    %c0_0 = arith.constant 0 : index
    %0 = vector.load %arg1[%c0, %c0_0] : memref<8x16xbf16, #tpu.memory_space<vmem>>, vector<8x16xbf16>
    %c0_1 = arith.constant 0 : index
    %c0_2 = arith.constant 0 : index
    %1 = vector.load %arg2[%c0_1, %c0_2] : memref<16x1024xbf16, #tpu.memory_space<vmem>>, vector<16x1024xbf16>
    %cst = arith.constant dense<0.000000e+00> : vector<8x1024xf32>
    %2 = tpu.matmul %0, %1, %cst {dimension_numbers = #tpu.dot_dimension_numbers<[1], [0], [0], [1], [0, 0, 1, 1], [], []>} : vector<8x16xbf16>, vector<16x1024xbf16>, vector<8x1024xf32> -> vector<8x1024xf32>
    %c0_3 = arith.constant 0 : index
    %c0_4 = arith.constant 0 : index
    %3 = vector.load %arg3[%c0_3, %c0_4] : memref<1x1024xf32, #tpu.memory_space<vmem>>, vector<1x1024xf32>
    %4 = vector.broadcast %3 : vector<1x1024xf32> to vector<8x1024xf32>
    %5 = arith.addf %2, %4 : vector<8x1024xf32>
    %cst_5 = arith.constant 0.000000e+00 : f32
    %6 = vector.broadcast %cst_5 : f32 to vector<8x1024xf32>
    %7 = arith.maximumf %5, %6 : vector<8x1024xf32>
    %8 = arith.truncf %7 : vector<8x1024xf32> to vector<8x1024xbf16>
    %c0_6 = arith.constant 0 : index
    %c0_7 = arith.constant 0 : index
    %9 = vector.load %arg4[%c0_6, %c0_7] : memref<1024x128xbf16, #tpu.memory_space<vmem>>, vector<1024x128xbf16>
    %cst_8 = arith.constant dense<0.000000e+00> : vector<8x128xf32>
    %10 = tpu.matmul %8, %9, %cst_8 {dimension_numbers = #tpu.dot_dimension_numbers<[1], [0], [0], [1], [0, 0, 1, 1], [], []>} : vector<8x1024xbf16>, vector<1024x128xbf16>, vector<8x128xf32> -> vector<8x128xf32>
    %c0_9 = arith.constant 0 : index
    %c0_10 = arith.constant 0 : index
    %11 = vector.load %arg5[%c0_9, %c0_10] : memref<1x128xf32, #tpu.memory_space<vmem>>, vector<1x128xf32>
    %12 = vector.broadcast %11 : vector<1x128xf32> to vector<8x128xf32>
    %13 = arith.addf %10, %12 : vector<8x128xf32>
    %c0_11 = arith.constant 0 : index
    %c0_12 = arith.constant 0 : index
    %14 = vector.load %arg6[%c0_11, %c0_12] : memref<8x128xf32, #tpu.memory_space<vmem>>, vector<8x128xf32>
    tpu.vector_store %arg6[%c0_11, %c0_12], %13 {strides = array<i32>} : memref<8x128xf32, #tpu.memory_space<vmem>>, vector<8x128xf32>,
    return
  }
  func.func @transform_0(%arg0: i32) -> (i32, i32) {
    %c0_i32 = arith.constant 0 : i32
    %c0_i32_0 = arith.constant 0 : i32
    return %arg0, %c0_i32 : i32, i32
  }
  func.func @transform_1(%arg0: i32) -> (i32, i32) {
    %c0_i32 = arith.constant 0 : i32
    %c0_i32_0 = arith.constant 0 : i32
    %c0_i32_1 = arith.constant 0 : i32
    return %c0_i32, %c0_i32_0 : i32, i32
  }
  func.func @transform_2(%arg0: i32) -> (i32, i32) {
    %c0_i32 = arith.constant 0 : i32
    %c0_i32_0 = arith.constant 0 : i32
    %c0_i32_1 = arith.constant 0 : i32
    return %c0_i32, %c0_i32_0 : i32, i32
  }
  func.func @transform_3(%arg0: i32) -> (i32, i32) {
    %c0_i32 = arith.constant 0 : i32
    %c0_i32_0 = arith.constant 0 : i32
    %c0_i32_1 = arith.constant 0 : i32
    return %c0_i32, %c0_i32_0 : i32, i32
  }
  func.func @transform_4(%arg0: i32) -> (i32, i32) {
    %c0_i32 = arith.constant 0 : i32
    %c0_i32_0 = arith.constant 0 : i32
    %c0_i32_1 = arith.constant 0 : i32
    return %c0_i32, %c0_i32_0 : i32, i32
  }
  func.func @transform_5(%arg0: i32) -> (i32, i32) {
    %c0_i32 = arith.constant 0 : i32
    %c0_i32_0 = arith.constant 0 : i32
    return %arg0, %c0_i32 : i32, i32
  }
}

</mosaic_0001>

<bundles_post_ra>
// kernel: tpu_custom_call.1
= control target key start
LH: loop header
LB: loop body
LE: loop exit
PB: predicated region body
PF: predicated region fallthrough
CT: control target
= control target key end

     0   :  { %10 = vsyncpa [#allocation3], 0  ;;  %s1483_s0 = inlined_call_operand.hbm [shape: bf16[8,16], index: 0, kind: input, shape index: {}]   ;;  %s1484_s1 = inlined_call_operand.hbm [shape: bf16[16,1024], index: 1, kind: input, shape index: {}]   ;;  %s1485_s2 = inlined_call_operand.hbm [shape: f32[1,1024], index: 2, kind: input, shape index: {}]   ;;  %s1486_s3 = inlined_call_operand.hbm [shape: bf16[1024,128], index: 3, kind: input, shape index: {}]   ;;  %s1487_s4 = inlined_call_operand.vmem [shape: f32[1,128], index: 4, kind: input, shape index: {}]   ;;  %s1488_s5 = inlined_call_operand.hbm [shape: f32[8,128], index: 5, kind: output, shape index: {}]  }
   0x1   :  { %11 = vsyncpa [#allocation6], 0 }
   0x2   :  { %12 = vsyncpa [#allocation9], 0  ;;  %s29_s20 = sshll.u32 %s1484_s1, 4  ;;  %s30_s20 = int_to_ptr.hbm [resolvable:$true] %s29_s20 }
   0x3   :  { %13 = vsyncpa [#allocation4], 0  ;;  %s1418_s21 = smov [#allocation5]   ;;  %s19_s25 = sshll.u32 %s1483_s0, 4  ;;  %s20_s25 = int_to_ptr.hbm [resolvable:$true] %s19_s25 }
   0x4   :  { %s31_s22 = sshll.u32 %s1418_s21, 4  ;;  %s1419_s26 = smov 512   ;;  %s32_s22 = int_to_ptr.vmem [resolvable:$true] %s31_s22 }
   0x5   :  { %s1420_s27 = smov 32   ;;  %s1421_s28 = smov [#allocation2]  }
   0x6   :  { %37 = dma.hbm_to_vmem [thread:$0]  %s30_s20, 1024, %s32_s22, [#allocation6], %s1419_s26, %s1419_s26, %s1420_s27  }
   0x7   :  { %s21_s29 = sshll.u32 %s1421_s28, 4  ;;  %s43_s7 = sshll.u32 %s1485_s2, 4  ;;  %s22_s29 = int_to_ptr.vmem [resolvable:$true] %s21_s29  ;;  %s44_s7 = int_to_ptr.hbm [resolvable:$true] %s43_s7 }
   0x8   :  { %24 = dma.hbm_to_vmem [thread:$0]  %s20_s25, 64, %s22_s29, [#allocation3]  }
   0x9   :  { %s53_s9 = sshll.u32 %s1486_s3, 4  ;;  %s1422_s10 = smov [#allocation7]   ;;  %s54_s9 = int_to_ptr.hbm [resolvable:$true] %s53_s9 }
   0xa   :  { %s45_s11 = sshll.u32 %s1422_s10, 4  ;;  %s1423_s0 = smov [#allocation8]   ;;  %s46_s11 = int_to_ptr.vmem [resolvable:$true] %s45_s11 }
   0xb   :  { %48 = dma.hbm_to_vmem [thread:$0]  %s44_s7, 128, %s46_s11, [#allocation6]  }
   0xc   :  { %s55_s12 = sshll.u32 %s1423_s0, 4  ;;  %s1424_s13 = smov 64   ;;  %s56_s12 = int_to_ptr.vmem [resolvable:$true] %s55_s12 }
   0xd   :  { %s1425_s14 = smov 4  }
   0xe   :  { %61 = dma.hbm_to_vmem [thread:$0]  %s54_s9, 8192, %s56_s12, [#allocation9], %s1424_s13, %s1424_s13, %s1425_s14  }
   0xf   :  { %1410 = dma.done.wait [#allocation3], 64  }
  0x10   :  { %1411 = vsyncadd [#allocation3], 4294967232 }
  0x11   :  { %1412 = dma.done.wait [#allocation6], 1152  }
  0x12   :  { %1413 = vsyncadd [#allocation6], 4294966144 }
  0x13   :  { %1414 = dma.done.wait [#allocation9], 8192  }
  0x14   :  { %1415 = vsyncadd [#allocation9], 4294959104  ;;  %vm148_vm0 = vcmask 130048   ;;  %v914_v0 = vld [vmem:[#allocation5] sm:$0xf]  ;;  %v1222_v29 = vld [vmem:[#allocation8 + $0x30] sm:$0xff] }
  0x15   :  { %v1212_v1 = vld [vmem:[#allocation5 + $0x1c] sm:$0xf0]  ;;  %v922_v2 = vld [vmem:[#allocation5 + $0x8] sm:$0xf]  ;;  %v1209_v5 = vld [vmem:[#allocation5 + $0xc] sm:$0xf] }
  0x16   :  { %v915_v3 = vor.u32 %v1212_v1, %v914_v0  ;;  %v1213_v4 = vld [vmem:[#allocation5 + $0x24] sm:$0xf0]  ;;  %v924_v6 = vld [vmem:[#allocation5 + $0x28] sm:$0xf0]  ;;  %v1208_v9 = vld [vmem:[#allocation5 + $0x4] sm:$0xf] }
  0x17   :  { %v923_v7 = vor.u32 %v1213_v4, %v922_v2  ;;  %v927_v8 = vor.u32 %v1209_v5, %v924_v6  ;;  %v916_v10 = vld [vmem:[#allocation5 + $0x20] sm:$0xf0]  ;;  %v81_v11 = vld [vmem:[#allocation2] sm:$0xf]  ;;  %v938_v13 = vld [vmem:[#allocation5 + $0x18] sm:$0xf] }
  0x18   :  { %159 = vmatpush.bf16.msra.mxu0 %v915_v3  ;;  %v919_v12 = vor.u32 %v1208_v9, %v916_v10  ;;  %v1215_v14 = vld [vmem:[#allocation5 + $0x34] sm:$0xf0]  ;;  %v1211_v15 = vld [vmem:[#allocation5 + $0x1c] sm:$0xf]  ;;  %v930_v18 = vld [vmem:[#allocation5 + $0x10] sm:$0xf] }
  0x19   :  { %185 = vmatpush.bf16.msra.mxu2 %v923_v7  ;;  %198 = vmatpush.bf16.msra.mxu3 %v927_v8  ;;  %v939_v16 = vor.u32 %v1215_v14, %v938_v13  ;;  %v940_v17 = vld [vmem:[#allocation5 + $0x38] sm:$0xf0]  ;;  %v1214_v19 = vld [vmem:[#allocation5 + $0x2c] sm:$0xf0]  ;;  %v1210_v22 = vld [vmem:[#allocation5 + $0x14] sm:$0xf] }
  0x1a   :  { %172 = vmatpush.bf16.msra.mxu1 %v919_v12  ;;  %v943_v20 = vor.u32 %v1211_v15, %v940_v17  ;;  %v931_v21 = vor.u32 %v1214_v19, %v930_v18  ;;  %v932_v23 = vld [vmem:[#allocation5 + $0x30] sm:$0xf0]  ;;  %v1223_v25 = vld [vmem:[#allocation8 + $0x38] sm:$0xff]  ;;  %v1230_v30 = vld [vmem:[#allocation8 + $0x70] sm:$0xff]  ;;  %s1426_s15 = smov [#allocation10]   ;;  %s900_s18 = sshll.u32 %s1488_s5, 4  ;;  %s901_s18 = int_to_ptr.hbm [resolvable:$true] %s900_s18 }
  0x1b   :  { %944 = vmatmul.msk.bf16.vlgmr.msra.gmra.mxu0 %vm148_vm0, %v81_v11  ;;  %v935_v24 = vor.u32 %v1210_v22, %v932_v23  ;;  %v1231_v26 = vld [vmem:[#allocation8 + $0x78] sm:$0xff]  ;;  %v1238_v31 = vld [vmem:[#allocation8 + $0xb0] sm:$0xff]  ;;  %v1221_v33 = vld [vmem:[#allocation8 + $0x28] sm:$0xff] }
  0x1c   :  { %946 = vmatmul.msk.bf16.vlgmr.msra.gmra.mxu2 %vm148_vm0, %v81_v11  ;;  %947 = vmatmul.msk.bf16.vlgmr.msra.gmra.mxu3 %vm148_vm0, %v81_v11  ;;  %v1239_v27 = vld [vmem:[#allocation8 + $0xb8] sm:$0xff]  ;;  %v1246_v32 = vld [vmem:[#allocation8 + $0xf0] sm:$0xff]  ;;  %v1229_v34 = vld [vmem:[#allocation8 + $0x68] sm:$0xff] }
  0x1d   :  { %237 = vmatpush.bf16.msrb.mxu2 %v939_v16  ;;  %v1247_v28 = vld [vmem:[#allocation8 + $0xf8] sm:$0xff]  ;;  %250 = vmatpush.bf16.msrb.mxu3 %v943_v20  ;;  %v1237_v35 = vld [vmem:[#allocation8 + $0xa8] sm:$0xff]  ;;  %v1228_v37 = vld [vmem:[#allocation8 + $0x60] sm:$0xff] }
  0x1e   :  { %945 = vmatmul.msk.bf16.vlgmr.msra.gmra.mxu1 %vm148_vm0, %v81_v11  ;;  %211 = vmatpush.bf16.msrb.mxu0 %v931_v21  ;;  %v1245_v36 = vld [vmem:[#allocation8 + $0xe8] sm:$0xff]  ;;  %v1220_v38 = vld [vmem:[#allocation8 + $0x20] sm:$0xff]  ;;  %v1227_v41 = vld [vmem:[#allocation8 + $0x58] sm:$0xff] }
  0x1f   :  { %224 = vmatpush.bf16.msrb.mxu1 %v935_v24  ;;  %v1236_v39 = vld [vmem:[#allocation8 + $0xa0] sm:$0xff]  ;;  %v1219_v42 = vld [vmem:[#allocation8 + $0x18] sm:$0xff]  ;;  %v1226_v45 = vld [vmem:[#allocation8 + $0x50] sm:$0xff] }
  0x20   :  { %v1244_v40 = vld [vmem:[#allocation8 + $0xe0] sm:$0xff]  ;;  %v1235_v43 = vld [vmem:[#allocation8 + $0x98] sm:$0xff]  ;;  %v1218_v46 = vld [vmem:[#allocation8 + $0x10] sm:$0xff] }
  0x21   :  { %814 = vmatpush.bf16.msra.mxu2 %v1239_v27  ;;  %827 = vmatpush.bf16.msra.mxu3 %v1247_v28  ;;  %v1243_v44 = vld [vmem:[#allocation8 + $0xd8] sm:$0xff]  ;;  %v1234_v47 = vld [vmem:[#allocation8 + $0x90] sm:$0xff]  ;;  %v1225_v49 = vld [vmem:[#allocation8 + $0x48] sm:$0xff] }
  0x22   :  { %788 = vmatpush.bf16.msra.mxu0 %v1223_v25  ;;  %v1242_v48 = vld [vmem:[#allocation8 + $0xd0] sm:$0xff]  ;;  %v1217_v50 = vld [vmem:[#allocation8 + $0x8] sm:$0xff]  ;;  %v1224_v53 = vld [vmem:[#allocation8 + $0x40] sm:$0xff] }
  0x23   :  { %801 = vmatpush.bf16.msra.mxu1 %v1231_v26  ;;  %v1233_v51 = vld [vmem:[#allocation8 + $0x88] sm:$0xff]  ;;  %v1263_v54 = vld [vmem:[#allocation8 + $0x178] sm:$0xff]  ;;  %v1216_v55 = vld [vmem:[#allocation8] sm:$0xff] }
  0x24   :  { %v1241_v52 = vld [vmem:[#allocation8 + $0xc8] sm:$0xff]  ;;  %v1255_v56 = vld [vmem:[#allocation8 + $0x138] sm:$0xff]  ;;  %v1232_v57 = vld [vmem:[#allocation8 + $0x80] sm:$0xff] }
  0x25   :  { %815 = vmatpush.bf16.msra.mxu2 %v1238_v31  ;;  %828 = vmatpush.bf16.msra.mxu3 %v1246_v32  ;;  %v1240_v58 = vld [vmem:[#allocation8 + $0xc0] sm:$0xff]  ;;  %v1271_v59 = vld [vmem:[#allocation8 + $0x1b8] sm:$0xff]  ;;  %v1262_v60 = vld [vmem:[#allocation8 + $0x170] sm:$0xff] }
  0x26   :  { %789 = vmatpush.bf16.msra.mxu0 %v1222_v29  ;;  %v1279_v61 = vld [vmem:[#allocation8 + $0x1f8] sm:$0xff]  ;;  %v1254_v62 = vld [vmem:[#allocation8 + $0x130] sm:$0xff]  ;;  %v1253_v63 = vld [vmem:[#allocation8 + $0x128] sm:$0xff] }
  0x27   :  { %802 = vmatpush.bf16.msra.mxu1 %v1230_v30  ;;  %v1261_v0 = vld [vmem:[#allocation8 + $0x168] sm:$0xff]  ;;  %v1270_v1 = vld [vmem:[#allocation8 + $0x1b0] sm:$0xff]  ;;  %v1252_v3 = vld [vmem:[#allocation8 + $0x120] sm:$0xff] }
  0x28   :  { %v1278_v2 = vld [vmem:[#allocation8 + $0x1f0] sm:$0xff]  ;;  %v1260_v4 = vld [vmem:[#allocation8 + $0x160] sm:$0xff]  ;;  %v1269_v5 = vld [vmem:[#allocation8 + $0x1a8] sm:$0xff] }
  0x29   :  { %816 = vmatpush.bf16.msra.mxu2 %v1237_v35  ;;  %829 = vmatpush.bf16.msra.mxu3 %v1245_v36  ;;  %v1277_v6 = vld [vmem:[#allocation8 + $0x1e8] sm:$0xff]  ;;  %v1251_v7 = vld [vmem:[#allocation8 + $0x118] sm:$0xff]  ;;  %v1268_v9 = vld [vmem:[#allocation8 + $0x1a0] sm:$0xff] }
  0x2a   :  { %790 = vmatpush.bf16.msra.mxu0 %v1221_v33  ;;  %v1259_v8 = vld [vmem:[#allocation8 + $0x158] sm:$0xff]  ;;  %v1276_v10 = vld [vmem:[#allocation8 + $0x1e0] sm:$0xff]  ;;  %v1258_v12 = vld [vmem:[#allocation8 + $0x150] sm:$0xff] }
  0x2b   :  { %803 = vmatpush.bf16.msra.mxu1 %v1229_v34  ;;  %948 = vmatmul.msk.bf16.vlgmr.msrb.gmra.mxu0 %vm148_vm0, %v81_v11  ;;  %v1267_v13 = vld [vmem:[#allocation8 + $0x198] sm:$0xff]  ;;  %v1249_v15 = vld [vmem:[#allocation8 + $0x108] sm:$0xff]  ;;  %v1266_v17 = vld [vmem:[#allocation8 + $0x190] sm:$0xff] }
  0x2c   :  { %950 = vmatmul.msk.bf16.vlgmr.msrb.gmra.mxu2 %vm148_vm0, %v81_v11  ;;  %951 = vmatmul.msk.bf16.vlgmr.msrb.gmra.mxu3 %vm148_vm0, %v81_v11  ;;  %v1275_v14 = vld [vmem:[#allocation8 + $0x1d8] sm:$0xff]  ;;  %v1257_v16 = vld [vmem:[#allocation8 + $0x148] sm:$0xff]  ;;  %v1274_v18 = vld [vmem:[#allocation8 + $0x1d0] sm:$0xff] }
  0x2d   :  { %817 = vmatpush.bf16.msra.mxu2 %v1236_v39  ;;  %830 = vmatpush.bf16.msra.mxu3 %v1244_v40  ;;  %v1248_v19 = vld [vmem:[#allocation8 + $0x100] sm:$0xff]  ;;  %v1265_v21 = vld [vmem:[#allocation8 + $0x188] sm:$0xff]  ;;  %v90_v25 = vld [vmem:[#allocation7] sm:$0xff] }
  0x2e   :  { %949 = vmatmul.msk.bf16.vlgmr.msrb.gmra.mxu1 %vm148_vm0, %v81_v11  ;;  %791 = vmatpush.bf16.msra.mxu0 %v1220_v38  ;;  %v1250_v11 = vld [vmem:[#allocation8 + $0x110] sm:$0xff]  ;;  %v1256_v20 = vld [vmem:[#allocation8 + $0x140] sm:$0xff]  ;;  %v1273_v22 = vld [vmem:[#allocation8 + $0x1c8] sm:$0xff]  ;;  %v92_v26 = vperm.slane %v90_v25, 0  ;;  %v93_v27 = vperm.slane %v90_v25, 1  ;;  %v94_v33 = vperm.slane %v90_v25, 2 }
  0x2f   :  { %804 = vmatpush.bf16.msra.mxu1 %v1228_v37  ;;  %v1264_v23 = vld [vmem:[#allocation8 + $0x180] sm:$0xff]  ;;  %v95_v34 = vperm.slane %v90_v25, 3 }
  0x30   :  { %v1272_v24 = vld [vmem:[#allocation8 + $0x1c0] sm:$0xff] }
  0x31   :  { %818 = vmatpush.bf16.msra.mxu2 %v1235_v43  ;;  %831 = vmatpush.bf16.msra.mxu3 %v1243_v44 }
  0x32   :  { %792 = vmatpush.bf16.msra.mxu0 %v1219_v42 }
  0x33   :  { %805 = vmatpush.bf16.msra.mxu1 %v1227_v41 }
  0x35   :  { %819 = vmatpush.bf16.msra.mxu2 %v1234_v47  ;;  %832 = vmatpush.bf16.msra.mxu3 %v1242_v48  ;;  %v96_v48 = vperm.slane %v90_v25, 4 }
  0x36   :  { %793 = vmatpush.bf16.msra.mxu0 %v1218_v46 }
  0x37   :  { %806 = vmatpush.bf16.msra.mxu1 %v1226_v45 }
  0x39   :  { %820 = vmatpush.bf16.msra.mxu2 %v1233_v51  ;;  %833 = vmatpush.bf16.msra.mxu3 %v1241_v52  ;;  %v97_v51 = vperm.slane %v90_v25, 5 }
  0x3a   :  { %794 = vmatpush.bf16.msra.mxu0 %v1217_v50 }
  0x3b   :  { %807 = vmatpush.bf16.msra.mxu1 %v1225_v49 }
  0x3d   :  { %821 = vmatpush.bf16.msra.mxu2 %v1232_v57  ;;  %834 = vmatpush.bf16.msra.mxu3 %v1240_v58  ;;  %v98_v57 = vperm.slane %v90_v25, 6  ;;  %v99_v58 = vperm.slane %v90_v25, 7 }
  0x3e   :  { %795 = vmatpush.bf16.msra.mxu0 %v1216_v55 }
  0x3f   :  { %808 = vmatpush.bf16.msra.mxu1 %v1224_v53 }
  0x41   :  { %866 = vmatpush.bf16.msrb.mxu2 %v1271_v59  ;;  %879 = vmatpush.bf16.msrb.mxu3 %v1279_v61 }
  0x42   :  { %840 = vmatpush.bf16.msrb.mxu0 %v1255_v56 }
  0x43   :  { %853 = vmatpush.bf16.msrb.mxu1 %v1263_v54 }
  0x45   :  { %867 = vmatpush.bf16.msrb.mxu2 %v1270_v1  ;;  %880 = vmatpush.bf16.msrb.mxu3 %v1278_v2 }
  0x46   :  { %841 = vmatpush.bf16.msrb.mxu0 %v1254_v62 }
  0x47   :  { %854 = vmatpush.bf16.msrb.mxu1 %v1262_v60 }
  0x49   :  { %868 = vmatpush.bf16.msrb.mxu2 %v1269_v5  ;;  %881 = vmatpush.bf16.msrb.mxu3 %v1277_v6 }
  0x4a   :  { %842 = vmatpush.bf16.msrb.mxu0 %v1253_v63 }
  0x4b   :  { %855 = vmatpush.bf16.msrb.mxu1 %v1261_v0 }
  0x4d   :  { %869 = vmatpush.bf16.msrb.mxu2 %v1268_v9  ;;  %882 = vmatpush.bf16.msrb.mxu3 %v1276_v10 }
  0x4e   :  { %843 = vmatpush.bf16.msrb.mxu0 %v1252_v3 }
  0x4f   :  { %856 = vmatpush.bf16.msrb.mxu1 %v1260_v4 }
  0x51   :  { %870 = vmatpush.bf16.msrb.mxu2 %v1267_v13  ;;  %883 = vmatpush.bf16.msrb.mxu3 %v1275_v14 }
  0x52   :  { %844 = vmatpush.bf16.msrb.mxu0 %v1251_v7 }
  0x53   :  { %857 = vmatpush.bf16.msrb.mxu1 %v1259_v8 }
  0x55   :  { %871 = vmatpush.bf16.msrb.mxu2 %v1266_v17  ;;  %884 = vmatpush.bf16.msrb.mxu3 %v1274_v18 }
  0x56   :  { %845 = vmatpush.bf16.msrb.mxu0 %v1250_v11 }
  0x57   :  { %858 = vmatpush.bf16.msrb.mxu1 %v1258_v12  ;;  %v1289_v12 = vld [vmem:[%s1487_s4] ss:$0 sm:$0xff]  ;;  %s898_s4 = sshll.u32 %s1426_s15, 4  ;;  %s899_s4 = int_to_ptr.vmem [resolvable:$true] %s898_s4 }
  0x59   :  { %872 = vmatpush.bf16.msrb.mxu2 %v1265_v21  ;;  %885 = vmatpush.bf16.msrb.mxu3 %v1273_v22 }
  0x5a   :  { %846 = vmatpush.bf16.msrb.mxu0 %v1249_v15 }
  0x5b   :  { %859 = vmatpush.bf16.msrb.mxu1 %v1257_v16 }
  0x5d   :  { %873 = vmatpush.bf16.msrb.mxu2 %v1264_v23  ;;  %886 = vmatpush.bf16.msrb.mxu3 %v1272_v24 }
  0x5e   :  { %847 = vmatpush.bf16.msrb.mxu0 %v1248_v19 }
  0x5f   :  { %860 = vmatpush.bf16.msrb.mxu1 %v1256_v20 }
  0x98   :  { %v161_v28 = vpop.f32.mrf.mxu0 }
  0x99   :  { %v162_v29 = vadd.f32 %v161_v28, %v92_v26 }
  0x9b   :  { %v174_v30 = vpop.f32.mrf.mxu1  ;;  %v256_v31 = vmax.f32 %v162_v29, 0.0 }
  0x9c   :  { %v175_v32 = vadd.f32 %v174_v30, %v93_v27 }
  0x9d   :  { %v264_v35 = vpack.c.bf16 %v256_v31, %v256_v31 }
  0x9e   :  { %v257_v36 = vmax.f32 %v175_v32, 0.0 }
  0x9f   :  { %v187_v38 = vpop.f32.mrf.mxu2  ;;  %v200_v39 = vpop.f32.mrf.mxu3  ;;  %796 = vmatmul.bf16.vlgmr.msra.gmra.mxu0 %v264_v35 }
  0xa0   :  { %v265_v37 = vpack.c.bf16 %v257_v36, %v257_v36  ;;  %v188_v40 = vadd.f32 %v187_v38, %v94_v33  ;;  %v201_v41 = vadd.f32 %v200_v39, %v95_v34  ;;  %v163_v42 = vpop.f32.mrf.mxu0 }
  0xa2   :  { %809 = vmatmul.bf16.vlgmr.msra.gmra.mxu1 %v265_v37  ;;  %v258_v43 = vmax.f32 %v188_v40, 0.0  ;;  %v259_v44 = vmax.f32 %v201_v41, 0.0 }
  0xa3   :  { %v176_v45 = vpop.f32.mrf.mxu1 }
  0xa4   :  { %v266_v46 = vpack.c.bf16 %v258_v43, %v258_v43  ;;  %v267_v47 = vpack.c.bf16 %v259_v44, %v259_v44 }
  0xa6   :  { %822 = vmatmul.bf16.vlgmr.msra.gmra.mxu2 %v266_v46  ;;  %835 = vmatmul.bf16.vlgmr.msra.gmra.mxu3 %v267_v47 }
  0xa7   :  { %v189_v49 = vpop.f32.mrf.mxu2  ;;  %v202_v50 = vpop.f32.mrf.mxu3 }
  0xa8   :  { %v213_v52 = vpop.f32.mrf.mxu0 }
  0xa9   :  { %v214_v53 = vadd.f32 %v213_v52, %v96_v48 }
  0xab   :  { %v226_v54 = vpop.f32.mrf.mxu1  ;;  %v260_v55 = vmax.f32 %v214_v53, 0.0 }
  0xac   :  { %v227_v56 = vadd.f32 %v226_v54, %v97_v51 }
  0xad   :  { %v268_v59 = vpack.c.bf16 %v260_v55, %v260_v55 }
  0xae   :  { %v261_v60 = vmax.f32 %v227_v56, 0.0 }
  0xaf   :  { %v239_v62 = vpop.f32.mrf.mxu2  ;;  %v252_v63 = vpop.f32.mrf.mxu3  ;;  %848 = vmatmul.bf16.vlgmr.msrb.gmra.mxu0 %v268_v59 }
  0xb0   :  { %v269_v61 = vpack.c.bf16 %v261_v60, %v261_v60  ;;  %v240_v0 = vadd.f32 %v239_v62, %v98_v57  ;;  %v253_v1 = vadd.f32 %v252_v63, %v99_v58  ;;  %v215_v2 = vpop.f32.mrf.mxu0 }
  0xb2   :  { %861 = vmatmul.bf16.vlgmr.msrb.gmra.mxu1 %v269_v61  ;;  %v262_v3 = vmax.f32 %v240_v0, 0.0  ;;  %v263_v4 = vmax.f32 %v253_v1, 0.0 }
  0xb3   :  { %v228_v5 = vpop.f32.mrf.mxu1 }
  0xb4   :  { %v270_v6 = vpack.c.bf16 %v262_v3, %v262_v3  ;;  %v271_v7 = vpack.c.bf16 %v263_v4, %v263_v4 }
  0xb6   :  { %874 = vmatmul.bf16.vlgmr.msrb.gmra.mxu2 %v270_v6  ;;  %887 = vmatmul.bf16.vlgmr.msrb.gmra.mxu3 %v271_v7 }
  0xb7   :  { %v241_v8 = vpop.f32.mrf.mxu2  ;;  %v254_v9 = vpop.f32.mrf.mxu3 }
 0x11c   :  { %v797_v10 = vpop.f32.mrf.mxu0 }
 0x11d   :  { %v798_v13 = vadd.f32 %v1289_v12, %v797_v10 }
 0x11f   :  { %v810_v11 = vpop.f32.mrf.mxu1 }
 0x120   :  { %v811_v16 = vadd.f32 %v810_v11, %v798_v13 }
 0x124   :  { %v799_v14 = vpop.f32.mrf.mxu0 }
 0x127   :  { %v812_v15 = vpop.f32.mrf.mxu1 }
 0x129   :  { %v823_v17 = vpop.f32.mrf.mxu2  ;;  %v836_v18 = vpop.f32.mrf.mxu3 }
 0x12a   :  { %v824_v19 = vadd.f32 %v823_v17, %v811_v16 }
 0x12c   :  { %v849_v20 = vpop.f32.mrf.mxu0  ;;  %v837_v22 = vadd.f32 %v836_v18, %v824_v19 }
 0x12e   :  { %v850_v25 = vadd.f32 %v849_v20, %v837_v22 }
 0x12f   :  { %v862_v21 = vpop.f32.mrf.mxu1 }
 0x130   :  { %v863_v28 = vadd.f32 %v862_v21, %v850_v25 }
 0x131   :  { %v825_v23 = vpop.f32.mrf.mxu2  ;;  %v838_v24 = vpop.f32.mrf.mxu3 }
 0x134   :  { %v851_v26 = vpop.f32.mrf.mxu0 }
 0x137   :  { %v864_v27 = vpop.f32.mrf.mxu1 }
 0x139   :  { %v875_v29 = vpop.f32.mrf.mxu2  ;;  %v888_v30 = vpop.f32.mrf.mxu3 }
 0x13a   :  { %v876_v31 = vadd.f32 %v875_v29, %v863_v28 }
 0x13c   :  { %v889_v32 = vadd.f32 %v888_v30, %v876_v31 }
 0x13e   :  { %892 = vst [vmem:[#allocation10] sm:$0xff] %v889_v32 }
 0x13f   :  { %903 = dma.vmem_to_hbm [thread:$0]  %s899_s4, 128, %s901_s18, [#allocation4]  }
 0x141   :  { %v877_v33 = vpop.f32.mrf.mxu2  ;;  %v890_v34 = vpop.f32.mrf.mxu3 }
 0x142   :  { %1416 = dma.done.wait [#allocation4], 128  }
 0x143   :  { %1417 = vsyncadd [#allocation4], 4294967168 }
 0x144   :  { %908 = vsyncpa [#allocation3], 1 }
 0x145   :  { %909 = vsyncpa [#allocation6], 1 }
 0x146   :  { %910 = vsyncpa [#allocation9], 1 }
 0x147   :  { %911 = vsyncpa [#allocation4], 1 }

</bundles_post_ra>
